<compile_context>
chip_gen: v6e
topology: v6e:2x2x1
jax: 0.10.0
libtpu: 0.0.40
codegen_flags: <defaults>
</compile_context>

<pallas_src>
import jax
import jax.numpy as jnp
from jax.experimental import pallas as pl
from jax.experimental.pallas import tpu as pltpu

INPUT_SIZE = 784
HIDDEN1 = 300
HIDDEN2 = 100
NUM_CLASSES = 10

# Lane-aligned (multiples of 128) padded dims.
IN_P = 896    # 784 -> 7*128
H1_P = 384    # 300 -> 3*128
H2_P = 128    # 100 -> 128
OUT_P = 128   # 10  -> 128


def _round_up(x, m):
    return ((x + m - 1) // m) * m


def _pad_to(a, shape):
    pads = [(0, s - d) for d, s in zip(a.shape, shape)]
    return jnp.pad(a, pads)


def mlp_kernel(x_ref, w1_ref, b1_ref, w2_ref, b2_ref, w3_ref, b3_ref, o_ref):
    # x tile: [TB, IN_P] bf16; weights bf16; biases f32. Accumulate in f32 on the MXU.
    x = x_ref[...]
    h1 = jnp.dot(x, w1_ref[...], preferred_element_type=jnp.float32) + b1_ref[...]
    # sigmoid = 1 / (1 + exp(-h1)): exp and reciprocal both run on the EUP slot.
    h1 = pl.reciprocal(1.0 + jnp.exp(-h1), approx=True)
    h1 = h1.astype(jnp.bfloat16)                     # padded cols give sigmoid(0)=0.5,
                                                     # killed by zero rows of w2 -> exact.
    h2 = jnp.dot(h1, w2_ref[...], preferred_element_type=jnp.float32) + b2_ref[...]
    h2 = h2.astype(jnp.bfloat16)
    out = jnp.dot(h2, w3_ref[...], preferred_element_type=jnp.float32) + b3_ref[...]
    o_ref[...] = out.astype(o_ref.dtype)             # [TB, OUT_P] lane-dense store


def mlp_forward(x, w1, b1, w2, b2, w3, b3, *, block_b=256):
    """x: [B, 784] f32. Returns [B, 10] f32 logits."""
    B = x.shape[0]
    # Batch tile: multiple of 8 (sublane), capped at block_b. Small batches -> one step.
    TB = min(block_b, _round_up(B, 8))
    B_pad = _round_up(B, TB)

    # Pad to lane-aligned shapes; bf16 matmul operands, f32 biases.
    x_p = _pad_to(x, (B_pad, IN_P)).astype(jnp.bfloat16)
    w1_p = _pad_to(w1, (IN_P, H1_P)).astype(jnp.bfloat16)
    b1_p = _pad_to(b1, (1, H1_P)).astype(jnp.float32)
    w2_p = _pad_to(w2, (H1_P, H2_P)).astype(jnp.bfloat16)
    b2_p = _pad_to(b2, (1, H2_P)).astype(jnp.float32)
    w3_p = _pad_to(w3, (H2_P, OUT_P)).astype(jnp.bfloat16)
    b3_p = _pad_to(b3, (1, OUT_P)).astype(jnp.float32)

    grid = (B_pad // TB,)

    flops = 2 * B * (INPUT_SIZE * HIDDEN1 + HIDDEN1 * HIDDEN2 + HIDDEN2 * NUM_CLASSES)
    bytes_accessed = (
        x_p.size * 2                                   # x (bf16)
        + (w1_p.size + w2_p.size + w3_p.size) * 2      # weights (bf16)
        + (b1_p.size + b2_p.size + b3_p.size) * 4      # biases (f32)
        + B_pad * OUT_P * 4                            # output (f32)
    )

    out_p = pl.pallas_call(
        mlp_kernel,
        out_shape=jax.ShapeDtypeStruct((B_pad, OUT_P), jnp.float32),
        grid_spec=pltpu.PrefetchScalarGridSpec(
            num_scalar_prefetch=0,
            grid=grid,
            in_specs=[
                pl.BlockSpec((TB, IN_P), lambda i: (i, 0)),     # x: tiled over batch
                pl.BlockSpec((IN_P, H1_P), lambda i: (0, 0)),   # w1: VMEM-resident
                pl.BlockSpec((1, H1_P), lambda i: (0, 0)),      # b1
                pl.BlockSpec((H1_P, H2_P), lambda i: (0, 0)),   # w2
                pl.BlockSpec((1, H2_P), lambda i: (0, 0)),      # b2
                pl.BlockSpec((H2_P, OUT_P), lambda i: (0, 0)),  # w3
                pl.BlockSpec((1, OUT_P), lambda i: (0, 0)),     # b3
            ],
            out_specs=pl.BlockSpec((TB, OUT_P), lambda i: (i, 0)),
        ),
        compiler_params=pltpu.CompilerParams(
            dimension_semantics=("parallel",)),
        cost_estimate=pl.CostEstimate(
            flops=flops,
            transcendentals=B * HIDDEN1,
            bytes_accessed=bytes_accessed),
    )(x_p, w1_p, b1_p, w2_p, b2_p, w3_p, b3_p)

    return out_p[:B, :NUM_CLASSES]


def init_linear(key, in_features, out_features):
    # Mirrors PyTorch nn.Linear default init: U(-1/sqrt(in), 1/sqrt(in)).
    kw, kb = jax.random.split(key)
    bound = 1.0 / jnp.sqrt(jnp.float32(in_features))
    w = jax.random.uniform(kw, (in_features, out_features), jnp.float32,
                           minval=-bound, maxval=bound)
    b = jax.random.uniform(kb, (1, out_features), jnp.float32,
                           minval=-bound, maxval=bound)
    return w, b


def reference_forward(x, w1, b1, w2, b2, w3, b3):
    h1 = jax.nn.sigmoid(x @ w1 + b1)
    h2 = h1 @ w2 + b2
    return h2 @ w3 + b3


if __name__ == "__main__":
    key = jax.random.PRNGKey(0)
    kx, k1, k2, k3 = jax.random.split(key, 4)

    batch = 8
    x = jax.random.normal(kx, (batch, INPUT_SIZE), jnp.float32)

    w1, b1 = init_linear(k1, INPUT_SIZE, HIDDEN1)
    w2, b2 = init_linear(k2, HIDDEN1, HIDDEN2)
    w3, b3 = init_linear(k3, HIDDEN2, NUM_CLASSES)

    out = mlp_forward(x, w1, b1, w2, b2, w3, b3)
    out = jax.block_until_ready(out)

    ref = reference_forward(x, w1, b1, w2, b2, w3, b3)
    assert out.shape == (batch, NUM_CLASSES)
    # bf16 MXU inputs (f32 accumulate) -> loosened tolerance vs the f32 reference.
    assert jnp.allclose(out, ref, atol=5e-2, rtol=5e-2), (
        float(jnp.max(jnp.abs(out - ref))))

    print("KERNEL_OK")
</pallas_src>

<mosaic_0001>
module attributes {stable_mosaic.version = 11 : i64} {
  func.func @mlp_kernel(%arg0: i32, %arg1: memref<8x896xbf16, #tpu.memory_space<vmem>>, %arg2: memref<896x384xbf16, #tpu.memory_space<vmem>>, %arg3: memref<1x384xf32, #tpu.memory_space<vmem>>, %arg4: memref<384x128xbf16, #tpu.memory_space<vmem>>, %arg5: memref<1x128xf32, #tpu.memory_space<vmem>>, %arg6: memref<128x128xbf16, #tpu.memory_space<vmem>>, %arg7: memref<1x128xf32, #tpu.memory_space<vmem>>, %arg8: memref<8x128xf32, #tpu.memory_space<vmem>>) attributes {dimension_semantics = [#tpu.dimension_semantics<parallel>], iteration_bounds = array<i64: 1>, scalar_prefetch = 0 : i64, scratch_operands = 0 : i64, tpu.core_type = #tpu.core_type<tc>, window_params = [{transform_indices = @transform_0, window_bounds = array<i64: 8, 896>}, {pipeline_mode = #tpu.pipeline_mode<synchronous>, transform_indices = @transform_1, window_bounds = array<i64: 896, 384>}, {pipeline_mode = #tpu.pipeline_mode<synchronous>, transform_indices = @transform_2, window_bounds = array<i64: 1, 384>}, {pipeline_mode = #tpu.pipeline_mode<synchronous>, transform_indices = @transform_3, window_bounds = array<i64: 384, 128>}, {pipeline_mode = #tpu.pipeline_mode<synchronous>, transform_indices = @transform_4, window_bounds = array<i64: 1, 128>}, {pipeline_mode = #tpu.pipeline_mode<synchronous>, transform_indices = @transform_5, window_bounds = array<i64: 128, 128>}, {pipeline_mode = #tpu.pipeline_mode<synchronous>, transform_indices = @transform_6, window_bounds = array<i64: 1, 128>}, {transform_indices = @transform_7, window_bounds = array<i64: 8, 128>}]} {
    %c0 = arith.constant 0 : index
    %c0_0 = arith.constant 0 : index
    %0 = vector.load %arg1[%c0, %c0_0] : memref<8x896xbf16, #tpu.memory_space<vmem>>, vector<8x896xbf16>
    %c0_1 = arith.constant 0 : index
    %c0_2 = arith.constant 0 : index
    %1 = vector.load %arg2[%c0_1, %c0_2] : memref<896x384xbf16, #tpu.memory_space<vmem>>, vector<896x384xbf16>
    %cst = arith.constant dense<0.000000e+00> : vector<8x384xf32>
    %2 = tpu.matmul %0, %1, %cst {dimension_numbers = #tpu.dot_dimension_numbers<[1], [0], [0], [1], [0, 0, 1, 1], [], []>} : vector<8x896xbf16>, vector<896x384xbf16>, vector<8x384xf32> -> vector<8x384xf32>
    %c0_3 = arith.constant 0 : index
    %c0_4 = arith.constant 0 : index
    %3 = vector.load %arg3[%c0_3, %c0_4] : memref<1x384xf32, #tpu.memory_space<vmem>>, vector<1x384xf32>
    %4 = vector.broadcast %3 : vector<1x384xf32> to vector<8x384xf32>
    %5 = arith.addf %2, %4 : vector<8x384xf32>
    %cst_5 = arith.constant 0.000000e+00 : f32
    %6 = vector.broadcast %cst_5 : f32 to vector<8x384xf32>
    %7 = arith.subf %6, %5 : vector<8x384xf32>
    %8 = math.exp %7 : vector<8x384xf32>
    %cst_6 = arith.constant 1.000000e+00 : f32
    %9 = vector.broadcast %cst_6 : f32 to vector<8x384xf32>
    %10 = arith.addf %9, %8 : vector<8x384xf32>
    %11 = tpu.reciprocal %10 {approx = true} : vector<8x384xf32> -> vector<8x384xf32>
    %12 = arith.truncf %11 : vector<8x384xf32> to vector<8x384xbf16>
    %c0_7 = arith.constant 0 : index
    %c0_8 = arith.constant 0 : index
    %13 = vector.load %arg4[%c0_7, %c0_8] : memref<384x128xbf16, #tpu.memory_space<vmem>>, vector<384x128xbf16>
    %cst_9 = arith.constant dense<0.000000e+00> : vector<8x128xf32>
    %14 = tpu.matmul %12, %13, %cst_9 {dimension_numbers = #tpu.dot_dimension_numbers<[1], [0], [0], [1], [0, 0, 1, 1], [], []>} : vector<8x384xbf16>, vector<384x128xbf16>, vector<8x128xf32> -> vector<8x128xf32>
    %c0_10 = arith.constant 0 : index
    %c0_11 = arith.constant 0 : index
    %15 = vector.load %arg5[%c0_10, %c0_11] : memref<1x128xf32, #tpu.memory_space<vmem>>, vector<1x128xf32>
    %16 = vector.broadcast %15 : vector<1x128xf32> to vector<8x128xf32>
    %17 = arith.addf %14, %16 : vector<8x128xf32>
    %18 = arith.truncf %17 : vector<8x128xf32> to vector<8x128xbf16>
    %c0_12 = arith.constant 0 : index
    %c0_13 = arith.constant 0 : index
    %19 = vector.load %arg6[%c0_12, %c0_13] : memref<128x128xbf16, #tpu.memory_space<vmem>>, vector<128x128xbf16>
    %cst_14 = arith.constant dense<0.000000e+00> : vector<8x128xf32>
    %20 = tpu.matmul %18, %19, %cst_14 {dimension_numbers = #tpu.dot_dimension_numbers<[1], [0], [0], [1], [0, 0, 1, 1], [], []>} : vector<8x128xbf16>, vector<128x128xbf16>, vector<8x128xf32> -> vector<8x128xf32>
    %c0_15 = arith.constant 0 : index
    %c0_16 = arith.constant 0 : index
    %21 = vector.load %arg7[%c0_15, %c0_16] : memref<1x128xf32, #tpu.memory_space<vmem>>, vector<1x128xf32>
    %22 = vector.broadcast %21 : vector<1x128xf32> to vector<8x128xf32>
    %23 = arith.addf %20, %22 : vector<8x128xf32>
    %c0_17 = arith.constant 0 : index
    %c0_18 = arith.constant 0 : index
    %24 = vector.load %arg8[%c0_17, %c0_18] : memref<8x128xf32, #tpu.memory_space<vmem>>, vector<8x128xf32>
    tpu.vector_store %arg8[%c0_17, %c0_18], %23 {strides = array<i32>} : memref<8x128xf32, #tpu.memory_space<vmem>>, vector<8x128xf32>,
    return
  }
  func.func @transform_0(%arg0: i32) -> (i32, i32) {
    %c0_i32 = arith.constant 0 : i32
    %c0_i32_0 = arith.constant 0 : i32
    return %arg0, %c0_i32 : i32, i32
  }
  func.func @transform_1(%arg0: i32) -> (i32, i32) {
    %c0_i32 = arith.constant 0 : i32
    %c0_i32_0 = arith.constant 0 : i32
    %c0_i32_1 = arith.constant 0 : i32
    return %c0_i32, %c0_i32_0 : i32, i32
  }
  func.func @transform_2(%arg0: i32) -> (i32, i32) {
    %c0_i32 = arith.constant 0 : i32
    %c0_i32_0 = arith.constant 0 : i32
    %c0_i32_1 = arith.constant 0 : i32
    return %c0_i32, %c0_i32_0 : i32, i32
  }
  func.func @transform_3(%arg0: i32) -> (i32, i32) {
    %c0_i32 = arith.constant 0 : i32
    %c0_i32_0 = arith.constant 0 : i32
    %c0_i32_1 = arith.constant 0 : i32
    return %c0_i32, %c0_i32_0 : i32, i32
  }
  func.func @transform_4(%arg0: i32) -> (i32, i32) {
    %c0_i32 = arith.constant 0 : i32
    %c0_i32_0 = arith.constant 0 : i32
    %c0_i32_1 = arith.constant 0 : i32
    return %c0_i32, %c0_i32_0 : i32, i32
  }
  func.func @transform_5(%arg0: i32) -> (i32, i32) {
    %c0_i32 = arith.constant 0 : i32
    %c0_i32_0 = arith.constant 0 : i32
    %c0_i32_1 = arith.constant 0 : i32
    return %c0_i32, %c0_i32_0 : i32, i32
  }
  func.func @transform_6(%arg0: i32) -> (i32, i32) {
    %c0_i32 = arith.constant 0 : i32
    %c0_i32_0 = arith.constant 0 : i32
    %c0_i32_1 = arith.constant 0 : i32
    return %c0_i32, %c0_i32_0 : i32, i32
  }
  func.func @transform_7(%arg0: i32) -> (i32, i32) {
    %c0_i32 = arith.constant 0 : i32
    %c0_i32_0 = arith.constant 0 : i32
    return %arg0, %c0_i32 : i32, i32
  }
}

</mosaic_0001>

<bundles_post_ra>
// kernel: tpu_custom_call.1
= control target key start
LH: loop header
LB: loop body
LE: loop exit
PB: predicated region body
PF: predicated region fallthrough
CT: control target
= control target key end

     0   :  { %12 = vsyncpa [#allocation3], 0  ;;  %s2917_s0 = inlined_call_operand.hbm [shape: bf16[8,896], index: 0, kind: input, shape index: {}]   ;;  %s2918_s1 = inlined_call_operand.hbm [shape: bf16[896,384], index: 1, kind: input, shape index: {}]   ;;  %s2919_s2 = inlined_call_operand.vmem [shape: f32[1,384], index: 2, kind: input, shape index: {}]   ;;  %s2920_s3 = inlined_call_operand.hbm [shape: bf16[384,128], index: 3, kind: input, shape index: {}]   ;;  %s2921_s4 = inlined_call_operand.vmem [shape: f32[1,128], index: 4, kind: input, shape index: {}]   ;;  %s2922_s5 = inlined_call_operand.hbm [shape: bf16[128,128], index: 5, kind: input, shape index: {}]   ;;  %s2923_s6 = inlined_call_operand.vmem [shape: f32[1,128], index: 6, kind: input, shape index: {}]   ;;  %s2924_s7 = inlined_call_operand.hbm [shape: f32[8,128], index: 7, kind: output, shape index: {}]  }
   0x1   :  { %13 = vsyncpa [#allocation6], 0 }
   0x2   :  { %14 = vsyncpa [#allocation9], 0 }
   0x3   :  { %15 = vsyncpa [#allocation4], 0  ;;  %s2777_s24 = smov [#allocation5]  }
   0x4   :  { %s31_s25 = sshll.u32 %s2777_s24, 4  ;;  %s32_s25 = int_to_ptr.vmem [resolvable:$true] %s31_s25 }
   0x5   :  { %s2677_s26 = scalar_lea.vmem %s32_s25, 21504  ;;  %p2682_p1 = scmp.lt.s32.totalorder %s32_s25, %s32_s25 }
   0x6   :  { %p2678_p0 = scmp.ne.s32.totalorder %s32_s25, %s2677_s26  ;;  %p2683_p2 = scmp.lt.s32.totalorder %s2677_s26, %s2677_s26 }
   0x8   :  { %p2684_p3 = por %p2683_p2, %p2682_p1 }
   0xa   :  { %p2685_p4 = pnand %p2684_p3, %p2678_p0 }
   0xc   :  { %2688 = shalt.err (!%p2685_p4)
}
   0xd   :  { %s2778_s27 = smov 192   ;;  %s2779_s28 = smov 12  }
   0xe   :  { %37 = dma.hbm_to_vmem [thread:$0]  %s2918_s1, 21504, %s32_s25, [#allocation6], %s2778_s27, %s2778_s27, %s2779_s28  }
   0xf   :  { %s2780_s8 = smov [#allocation2]   ;;  %s2781_s10 = smov [#allocation7]  }
  0x10   :  { %s22_s9 = sshll.u32 %s2780_s8, 4  ;;  %s45_s11 = sshll.u32 %s2781_s10, 4  ;;  %s23_s9 = int_to_ptr.vmem [resolvable:$true] %s22_s9  ;;  %s46_s11 = int_to_ptr.vmem [resolvable:$true] %s45_s11 }
  0x11   :  { %s2697_s12 = scalar_lea.vmem %s23_s9, 448  ;;  %p2702_p6 = scmp.lt.s32.totalorder %s23_s9, %s23_s9 }
  0x12   :  { %p2698_p5 = scmp.ne.s32.totalorder %s23_s9, %s2697_s12  ;;  %p2703_p7 = scmp.lt.s32.totalorder %s2697_s12, %s2697_s12 }
  0x14   :  { %p2704_p8 = por %p2703_p7, %p2702_p6 }
  0x16   :  { %p2705_p9 = pnand %p2704_p8, %p2698_p5 }
  0x18   :  { %2708 = shalt.err (!%p2705_p9)
}
  0x19   :  { %25 = dma.hbm_to_vmem [thread:$0]  %s2917_s0, 448, %s23_s9, [#allocation3]  }
  0x1a   :  { %s2717_s15 = scalar_lea.vmem %s46_s11, 3072  ;;  %p2722_p11 = scmp.lt.s32.totalorder %s46_s11, %s46_s11 }
  0x1b   :  { %p2718_p10 = scmp.ne.s32.totalorder %s46_s11, %s2717_s15  ;;  %p2723_p12 = scmp.lt.s32.totalorder %s2717_s15, %s2717_s15 }
  0x1d   :  { %p2724_p13 = por %p2723_p12, %p2722_p11 }
  0x1f   :  { %p2725_p0 = pnand %p2724_p13, %p2718_p10 }
  0x21   :  { %2728 = shalt.err (!%p2725_p0)
}
  0x22   :  { %s2782_s1 = smov 64   ;;  %s2783_s16 = smov 4  }
  0x23   :  { %51 = dma.hbm_to_vmem [thread:$0]  %s2920_s3, 3072, %s46_s11, [#allocation6], %s2782_s1, %s2782_s1, %s2783_s16  }
  0x24   :  { %s2784_s19 = smov [#allocation8]  }
  0x25   :  { %s59_s20 = sshll.u32 %s2784_s19, 4  ;;  %s60_s20 = int_to_ptr.vmem [resolvable:$true] %s59_s20 }
  0x26   :  { %s2737_s21 = scalar_lea.vmem %s60_s20, 1024  ;;  %p2742_p2 = scmp.lt.s32.totalorder %s60_s20, %s60_s20 }
  0x27   :  { %p2738_p1 = scmp.ne.s32.totalorder %s60_s20, %s2737_s21  ;;  %p2743_p3 = scmp.lt.s32.totalorder %s2737_s21, %s2737_s21 }
  0x29   :  { %p2744_p4 = por %p2743_p3, %p2742_p2 }
  0x2b   :  { %p2745_p5 = pnand %p2744_p4, %p2738_p1 }
  0x2d   :  { %2748 = shalt.err (!%p2745_p5)
}
  0x2e   :  { %65 = dma.hbm_to_vmem [thread:$0]  %s2922_s5, 1024, %s60_s20, [#allocation9], %s2782_s1, %s2782_s1, %s2783_s16  }
  0x2f   :  { %2769 = dma.done.wait [#allocation3], 448  }
  0x30   :  { %2770 = vsyncadd [#allocation3], 4294966848 }
  0x31   :  { %2771 = dma.done.wait [#allocation6], 24576  }
  0x32   :  { %2772 = vsyncadd [#allocation6], 4294942720 }
  0x33   :  { %2773 = dma.done.wait [#allocation9], 1024  }
  0x34   :  { %2774 = vsyncadd [#allocation9], 4294966272  ;;  %v2394_v0 = vld [vmem:[#allocation5 + $0xac] ss:$12 sps:$4 sm:$0xff]   ;;  %v2396_v1 = vld [vmem:[#allocation5 + $0xa8] ss:$12 sps:$4 sm:$0xff]  }
  0x35   :  { %1247 = vmatprep.subr.bf16.mxu0 %v2394_v0  ;;  %v2397_v2 = vld [vmem:[#allocation5 + $0x22c] ss:$12 sps:$4 sm:$0xff]   ;;  %v2399_v3 = vld [vmem:[#allocation5 + $0x228] ss:$12 sps:$4 sm:$0xff]   ;;  %v2402_v5 = vld [vmem:[#allocation5 + $0x90] ss:$12 sps:$4 sm:$0xff]  }
  0x36   :  { %1248 = vmatpush1.bf16.msra.mxu0 %v2396_v1  ;;  %v2400_v4 = vld [vmem:[#allocation5 + $0x94] ss:$12 sps:$4 sm:$0xff]   ;;  %1288 = vmatprep.subr.bf16.mxu1 %v2397_v2  ;;  %v2405_v7 = vld [vmem:[#allocation5 + $0x210] ss:$12 sps:$4 sm:$0xff]   ;;  %v2408_v9 = vld [vmem:[#allocation5 + $0x78] ss:$12 sps:$4 sm:$0xff]  }
  0x37   :  { %v2403_v6 = vld [vmem:[#allocation5 + $0x214] ss:$12 sps:$4 sm:$0xff]   ;;  %1289 = vmatpush1.bf16.msra.mxu1 %v2399_v3  ;;  %1249 = vmatprep.subr.bf16.mxu0 %v2400_v4  ;;  %v2406_v8 = vld [vmem:[#allocation5 + $0x7c] ss:$12 sps:$4 sm:$0xff]   ;;  %v2412_v11 = vld [vmem:[#allocation5 + $0x64] ss:$12 sps:$4 sm:$0xff]  }
  0x38   :  { %1290 = vmatprep.subr.bf16.mxu1 %v2403_v6  ;;  %v2409_v10 = vld [vmem:[#allocation5 + $0x1fc] ss:$12 sps:$4 sm:$0xff]   ;;  %v2411_v12 = vld [vmem:[#allocation5 + $0x1f8] ss:$12 sps:$4 sm:$0xff]   ;;  %v2414_v14 = vld [vmem:[#allocation5 + $0x60] ss:$12 sps:$4 sm:$0xff]  }
  0x39   :  { %v2415_v13 = vld [vmem:[#allocation5 + $0x1e4] ss:$12 sps:$4 sm:$0xff]   ;;  %v2418_v15 = vld [vmem:[#allocation5 + $0x4c] ss:$12 sps:$4 sm:$0xff]   ;;  %v2420_v18 = vld [vmem:[#allocation5 + $0x48] ss:$12 sps:$4 sm:$0xff]  }
  0x3a   :  { %1250 = vmatpush1.bf16.msra.mxu0 %v2402_v5  ;;  %v2417_v16 = vld [vmem:[#allocation5 + $0x1e0] ss:$12 sps:$4 sm:$0xff]   ;;  %v2423_v20 = vld [vmem:[#allocation5 + $0x1c8] ss:$12 sps:$4 sm:$0xff]   ;;  %v2426_v22 = vld [vmem:[#allocation5 + $0x30] ss:$12 sps:$4 sm:$0xff]  }
  0x3b   :  { %1251 = vmatprep.subr.bf16.mxu0 %v2406_v8  ;;  %1291 = vmatpush1.bf16.msra.mxu1 %v2405_v7  ;;  %v2421_v17 = vld [vmem:[#allocation5 + $0x1cc] ss:$12 sps:$4 sm:$0xff]   ;;  %v2424_v19 = vld [vmem:[#allocation5 + $0x34] ss:$12 sps:$4 sm:$0xff]   ;;  %v2430_v23 = vld [vmem:[#allocation5 + $0x1c] ss:$12 sps:$4 sm:$0xff]  }
  0x3c   :  { %1292 = vmatprep.subr.bf16.mxu1 %v2409_v10  ;;  %v2427_v21 = vld [vmem:[#allocation5 + $0x1b4] ss:$12 sps:$4 sm:$0xff]   ;;  %v2429_v24 = vld [vmem:[#allocation5 + $0x1b0] ss:$12 sps:$4 sm:$0xff]   ;;  %v2432_v26 = vld [vmem:[#allocation5 + $0x18] ss:$12 sps:$4 sm:$0xff]  }
  0x3d   :  { %v2433_v25 = vld [vmem:[#allocation5 + $0x19c] ss:$12 sps:$4 sm:$0xff]   ;;  %v2436_v27 = vld [vmem:[#allocation5 + $0x4] ss:$12 sps:$4 sm:$0xff]   ;;  %v2438_v30 = vld [vmem:[#allocation5] ss:$12 sps:$4 sm:$0xff]  }
  0x3e   :  { %1252 = vmatpush1.bf16.msra.mxu0 %v2408_v9  ;;  %v2435_v28 = vld [vmem:[#allocation5 + $0x198] ss:$12 sps:$4 sm:$0xff]   ;;  %v2441_v32 = vld [vmem:[#allocation5 + $0x180] ss:$12 sps:$4 sm:$0xff]   ;;  %v2444_v34 = vld [vmem:[#allocation5 + $0x168] ss:$12 sps:$4 sm:$0xff]  }
  0x3f   :  { %1253 = vmatprep.subr.bf16.mxu0 %v2412_v11  ;;  %1293 = vmatpush1.bf16.msra.mxu1 %v2411_v12  ;;  %v2439_v29 = vld [vmem:[#allocation5 + $0x184] ss:$12 sps:$4 sm:$0xff]   ;;  %v2442_v31 = vld [vmem:[#allocation5 + $0x16c] ss:$12 sps:$4 sm:$0xff]   ;;  %v2448_v35 = vld [vmem:[#allocation5 + $0x154] ss:$12 sps:$4 sm:$0xff]  }
  0x40   :  { %1294 = vmatprep.subr.bf16.mxu1 %v2415_v13  ;;  %v2445_v33 = vld [vmem:[#allocation5 + $0x2ec] ss:$12 sps:$4 sm:$0xff]   ;;  %v2447_v36 = vld [vmem:[#allocation5 + $0x2e8] ss:$12 sps:$4 sm:$0xff]   ;;  %v2450_v38 = vld [vmem:[#allocation5 + $0x150] ss:$12 sps:$4 sm:$0xff]  }
  0x41   :  { %v2451_v37 = vld [vmem:[#allocation5 + $0x2d4] ss:$12 sps:$4 sm:$0xff]   ;;  %v2454_v39 = vld [vmem:[#allocation5 + $0x13c] ss:$12 sps:$4 sm:$0xff]   ;;  %v2456_v42 = vld [vmem:[#allocation5 + $0x138] ss:$12 sps:$4 sm:$0xff]  }
  0x42   :  { %1254 = vmatpush1.bf16.msra.mxu0 %v2414_v14  ;;  %v2453_v40 = vld [vmem:[#allocation5 + $0x2d0] ss:$12 sps:$4 sm:$0xff]   ;;  %v2459_v44 = vld [vmem:[#allocation5 + $0x2b8] ss:$12 sps:$4 sm:$0xff]   ;;  %v2462_v47 = vld [vmem:[#allocation5 + $0x120] ss:$12 sps:$4 sm:$0xff]  }
  0x43   :  { %1255 = vmatprep.subr.bf16.mxu0 %v2418_v15  ;;  %1295 = vmatpush1.bf16.msra.mxu1 %v2417_v16  ;;  %v2457_v41 = vld [vmem:[#allocation5 + $0x2bc] ss:$12 sps:$4 sm:$0xff]   ;;  %v2460_v43 = vld [vmem:[#allocation5 + $0x124] ss:$12 sps:$4 sm:$0xff]   ;;  %v2466_v49 = vld [vmem:[#allocation5 + $0x10c] ss:$12 sps:$4 sm:$0xff]  }
  0x44   :  { %1296 = vmatprep.subr.bf16.mxu1 %v2421_v17  ;;  %v2463_v45 = vld [vmem:[#allocation5 + $0x2a4] ss:$12 sps:$4 sm:$0xff]   ;;  %v2465_v51 = vld [vmem:[#allocation5 + $0x2a0] ss:$12 sps:$4 sm:$0xff]   ;;  %v2468_v54 = vld [vmem:[#allocation5 + $0x108] ss:$12 sps:$4 sm:$0xff]  }
  0x45   :  { %v81_v46 = vld [vmem:[#allocation2] sm:$0xff]  ;;  %v82_v50 = vld [vmem:[#allocation2 + $0x8] sm:$0xff]  ;;  %v2472_v55 = vld [vmem:[#allocation5 + $0xf4] ss:$12 sps:$4 sm:$0xff]   ;;  %v2785_v15 = vmov 0   ;;  %vm2787_vm0 = vmmov 0  }
  0x46   :  { %1256 = vmatpush1.bf16.msra.mxu0 %v2420_v18  ;;  %v2841_v48 = vcombine.high %v81_v46, %v81_v46  ;;  %v2844_v52 = vcombine.high %v82_v50, %v82_v50  ;;  %v2469_v53 = vld [vmem:[#allocation5 + $0x28c] ss:$12 sps:$4 sm:$0xff]   ;;  %v2471_v56 = vld [vmem:[#allocation5 + $0x288] ss:$12 sps:$4 sm:$0xff]   ;;  %v2474_v58 = vld [vmem:[#allocation5 + $0xf0] ss:$12 sps:$4 sm:$0xff]   ;;  %v2847_v5 = vcombine.low %v81_v46, %v81_v46  ;;  %v2849_v8 = vcombine.low %v82_v50, %v82_v50 }
  0x47   :  { %1257 = vmatprep.subr.bf16.mxu0 %v2424_v19  ;;  %1297 = vmatpush1.bf16.msra.mxu1 %v2423_v20  ;;  %v2475_v57 = vld [vmem:[#allocation5 + $0x274] ss:$12 sps:$4 sm:$0xff]   ;;  %v2478_v59 = vld [vmem:[#allocation5 + $0xdc] ss:$12 sps:$4 sm:$0xff]   ;;  %v2480_v62 = vld [vmem:[#allocation5 + $0xd8] ss:$12 sps:$4 sm:$0xff]  }
  0x48   :  { %1298 = vmatprep.subr.bf16.mxu1 %v2427_v21  ;;  %1279 = vmatprep.mubr.bf16.mxu0 %v2841_v48  ;;  %v2477_v60 = vld [vmem:[#allocation5 + $0x270] ss:$12 sps:$4 sm:$0xff]   ;;  %v2483_v0 = vld [vmem:[#allocation5 + $0x258] ss:$12 sps:$4 sm:$0xff]   ;;  %v2486_v2 = vld [vmem:[#allocation5 + $0xc0] ss:$12 sps:$4 sm:$0xff]  }
  0x49   :  { %1320 = vmatprep.mubr.bf16.mxu1 %v2844_v52  ;;  %v2481_v61 = vld [vmem:[#allocation5 + $0x25c] ss:$12 sps:$4 sm:$0xff]   ;;  %v2484_v63 = vld [vmem:[#allocation5 + $0xc4] ss:$12 sps:$4 sm:$0xff]   ;;  %v2494_v3 = vld [vmem:[#allocation5 + $0x3ac] ss:$12 sps:$4 sm:$0xff]  }
  0x4a   :  { %1258 = vmatpush1.bf16.msra.mxu0 %v2426_v22  ;;  %v2487_v1 = vld [vmem:[#allocation5 + $0x244] ss:$12 sps:$4 sm:$0xff]   ;;  %v2491_v4 = vld [vmem:[#allocation5 + $0x240] ss:$12 sps:$4 sm:$0xff]   ;;  %v2492_v7 = vld [vmem:[#allocation5 + $0x3a8] ss:$12 sps:$4 sm:$0xff]  }
  0x4b   :  { %1259 = vmatprep.subr.bf16.mxu0 %v2430_v23  ;;  %1299 = vmatpush1.bf16.msra.mxu1 %v2429_v24  ;;  %v2499_v6 = vld [vmem:[#allocation5 + $0x52c] ss:$12 sps:$4 sm:$0xff]   ;;  %v2502_v9 = vld [vmem:[#allocation5 + $0x394] ss:$12 sps:$4 sm:$0xff]   ;;  %v2500_v12 = vld [vmem:[#allocation5 + $0x390] ss:$12 sps:$4 sm:$0xff]  }
  0x4c   :  { %1300 = vmatprep.subr.bf16.mxu1 %v2433_v25  ;;  %v2497_v10 = vld [vmem:[#allocation5 + $0x528] ss:$12 sps:$4 sm:$0xff]   ;;  %v2503_v14 = vld [vmem:[#allocation5 + $0x510] ss:$12 sps:$4 sm:$0xff]   ;;  %v2506_v17 = vld [vmem:[#allocation5 + $0x378] ss:$12 sps:$4 sm:$0xff]  }
  0x4d   :  { %v2505_v11 = vld [vmem:[#allocation5 + $0x514] ss:$12 sps:$4 sm:$0xff]   ;;  %v2508_v13 = vld [vmem:[#allocation5 + $0x37c] ss:$12 sps:$4 sm:$0xff]   ;;  %v2514_v18 = vld [vmem:[#allocation5 + $0x364] ss:$12 sps:$4 sm:$0xff]  }
  0x4e   :  { %1260 = vmatpush1.bf16.msra.mxu0 %v2432_v26  ;;  %v2511_v16 = vld [vmem:[#allocation5 + $0x4fc] ss:$12 sps:$4 sm:$0xff]   ;;  %v2509_v19 = vld [vmem:[#allocation5 + $0x4f8] ss:$12 sps:$4 sm:$0xff]   ;;  %v2512_v21 = vld [vmem:[#allocation5 + $0x360] ss:$12 sps:$4 sm:$0xff]  }
  0x4f   :  { %1261 = vmatprep.subr.bf16.mxu0 %v2436_v27  ;;  %1301 = vmatpush1.bf16.msra.mxu1 %v2435_v28  ;;  %v2517_v20 = vld [vmem:[#allocation5 + $0x4e4] ss:$12 sps:$4 sm:$0xff]   ;;  %v2520_v22 = vld [vmem:[#allocation5 + $0x34c] ss:$12 sps:$4 sm:$0xff]   ;;  %v2518_v25 = vld [vmem:[#allocation5 + $0x348] ss:$12 sps:$4 sm:$0xff]  }
  0x50   :  { %1302 = vmatprep.subr.bf16.mxu1 %v2439_v29  ;;  %v2515_v23 = vld [vmem:[#allocation5 + $0x4e0] ss:$12 sps:$4 sm:$0xff]   ;;  %v2521_v27 = vld [vmem:[#allocation5 + $0x4c8] ss:$12 sps:$4 sm:$0xff]   ;;  %v2524_v29 = vld [vmem:[#allocation5 + $0x330] ss:$12 sps:$4 sm:$0xff]  }
  0x51   :  { %v2523_v24 = vld [vmem:[#allocation5 + $0x4cc] ss:$12 sps:$4 sm:$0xff]   ;;  %v2526_v26 = vld [vmem:[#allocation5 + $0x334] ss:$12 sps:$4 sm:$0xff]   ;;  %v2547_v46 = vld [vmem:[#allocation5 + $0xb0] ss:$12 sps:$4 sm:$0xff]  }
  0x52   :  { %1262 = vmatpush1.bf16.msra.mxu0 %v2438_v30  ;;  %v2529_v28 = vld [vmem:[#allocation5 + $0x4b4] ss:$12 sps:$4 sm:$0xff]   ;;  %v2532_v30 = vld [vmem:[#allocation5 + $0x31c] ss:$12 sps:$4 sm:$0xff]   ;;  %s2788_s26 = smov [#allocation10]  }
  0x53   :  { %1263 = vmatprep.subr.bf16.mxu0 %v2442_v31  ;;  %1303 = vmatpush1.bf16.msra.mxu1 %v2441_v32  ;;  %v2527_v31 = vld [vmem:[#allocation5 + $0x4b0] ss:$12 sps:$4 sm:$0xff]   ;;  %s1987_s27 = sshll.u32 %s2788_s26, 4  ;;  %s1988_s27 = int_to_ptr.vmem [resolvable:$true] %s1987_s27 }
  0x54   :  { %1304 = vmatprep.subr.bf16.mxu1 %v2445_v33  ;;  %v2535_v32 = vld [vmem:[#allocation5 + $0x49c] ss:$12 sps:$4 sm:$0xff]   ;;  %v2530_v33 = vld [vmem:[#allocation5 + $0x318] ss:$12 sps:$4 sm:$0xff]   ;;  %p2754_p7 = scmp.lt.s32.totalorder %s1988_s27, %s1988_s27 }
  0x55   :  { %v2555_v50 = vld [vmem:[#allocation5 + $0x43c] ss:$12 sps:$4 sm:$0xff]  }
  0x56   :  { %1264 = vmatpush2.bf16.msra.mxu0 %v2444_v34  ;;  %v2538_v34 = vld [vmem:[#allocation5 + $0x304] ss:$12 sps:$4 sm:$0xff]  }
  0x57   :  { %1265 = vmatprep.subr.bf16.mxu0 %v2448_v35  ;;  %1305 = vmatpush2.bf16.msra.mxu1 %v2447_v36  ;;  %v2533_v35 = vld [vmem:[#allocation5 + $0x498] ss:$12 sps:$4 sm:$0xff]   ;;  %v2536_v36 = vld [vmem:[#allocation5 + $0x300] ss:$12 sps:$4 sm:$0xff]  }
  0x58   :  { %1306 = vmatprep.subr.bf16.mxu1 %v2451_v37  ;;  %v2541_v37 = vld [vmem:[#allocation5 + $0x484] ss:$12 sps:$4 sm:$0xff]  }
  0x5a   :  { %1266 = vmatpush2.bf16.msra.mxu0 %v2450_v38  ;;  %v2539_v38 = vld [vmem:[#allocation5 + $0x480] ss:$12 sps:$4 sm:$0xff]  }
  0x5b   :  { %1267 = vmatprep.subr.bf16.mxu0 %v2454_v39  ;;  %1307 = vmatpush2.bf16.msra.mxu1 %v2453_v40  ;;  %v2853_v39 = vld [vmem:[#allocation2 + $0x10] sm:$0xff] }
  0x5c   :  { %1308 = vmatprep.subr.bf16.mxu1 %v2457_v41  ;;  %v2544_v40 = vld [vmem:[#allocation5 + $0x46c] ss:$12 sps:$4 sm:$0xff]   ;;  %v2857_v41 = vcombine.high %v2853_v39, %v2853_v39 }
  0x5e   :  { %1268 = vmatpush2.bf16.msra.mxu0 %v2456_v42  ;;  %v2542_v42 = vld [vmem:[#allocation5 + $0x468] ss:$12 sps:$4 sm:$0xff]  }
  0x5f   :  { %1269 = vmatprep.subr.bf16.mxu0 %v2460_v43  ;;  %1309 = vmatpush2.bf16.msra.mxu1 %v2459_v44  ;;  %v2545_v43 = vld [vmem:[#allocation5 + $0x170] ss:$12 sps:$4 sm:$0xff]  }
  0x60   :  { %1310 = vmatprep.subr.bf16.mxu1 %v2463_v45  ;;  %v2860_v44 = vld [vmem:[#allocation2 + $0x18] ss:$0 sps:$4 sm:$0xff]   ;;  %v2550_v45 = vld [vmem:[#allocation5 + $0x454] ss:$12 sps:$4 sm:$0xff]  }
  0x62   :  { %1270 = vmatpush2.bf16.msra.mxu0 %v2462_v47  ;;  %v2551_v47 = vld [vmem:[#allocation5 + $0x158] ss:$12 sps:$4 sm:$0xff]  }
  0x63   :  { %1271 = vmatprep.subr.bf16.mxu0 %v2466_v49  ;;  %1311 = vmatpush2.bf16.msra.mxu1 %v2465_v51  ;;  %v2548_v49 = vld [vmem:[#allocation5 + $0x450] ss:$12 sps:$4 sm:$0xff]   ;;  %v2552_v51 = vld [vmem:[#allocation5 + $0x98] ss:$12 sps:$4 sm:$0xff]  }
  0x64   :  { %1312 = vmatprep.subr.bf16.mxu1 %v2469_v53  ;;  %v2556_v53 = vld [vmem:[#allocation5 + $0x140] ss:$12 sps:$4 sm:$0xff]  }
  0x66   :  { %1272 = vmatpush2.bf16.msra.mxu0 %v2468_v54  ;;  %v2553_v54 = vld [vmem:[#allocation5 + $0x438] ss:$12 sps:$4 sm:$0xff]  }
  0x67   :  { %1273 = vmatprep.subr.bf16.mxu0 %v2472_v55  ;;  %1313 = vmatpush2.bf16.msra.mxu1 %v2471_v56  ;;  %v2560_v55 = vld [vmem:[#allocation5 + $0x424] ss:$12 sps:$4 sm:$0xff]   ;;  %v2557_v56 = vld [vmem:[#allocation5 + $0x80] ss:$12 sps:$4 sm:$0xff]  }
  0x68   :  { %1314 = vmatprep.subr.bf16.mxu1 %v2475_v57  ;;  %v2561_v57 = vld [vmem:[#allocation5 + $0x128] ss:$12 sps:$4 sm:$0xff]  }
  0x6a   :  { %1274 = vmatpush2.bf16.msra.mxu0 %v2474_v58  ;;  %v2558_v58 = vld [vmem:[#allocation5 + $0x420] ss:$12 sps:$4 sm:$0xff]  }
  0x6b   :  { %1275 = vmatprep.subr.bf16.mxu0 %v2478_v59  ;;  %1315 = vmatpush2.bf16.msra.mxu1 %v2477_v60  ;;  %v2565_v59 = vld [vmem:[#allocation5 + $0x40c] ss:$12 sps:$4 sm:$0xff]   ;;  %v2562_v60 = vld [vmem:[#allocation5 + $0x68] ss:$12 sps:$4 sm:$0xff]  }
  0x6c   :  { %1316 = vmatprep.subr.bf16.mxu1 %v2481_v61  ;;  %v2566_v61 = vld [vmem:[#allocation5 + $0x110] ss:$12 sps:$4 sm:$0xff]  }
  0x6e   :  { %1276 = vmatpush2.bf16.msra.mxu0 %v2480_v62  ;;  %v2570_v62 = vld [vmem:[#allocation5 + $0x3f4] ss:$12 sps:$4 sm:$0xff]  }
  0x6f   :  { %1277 = vmatprep.subr.bf16.mxu0 %v2484_v63  ;;  %1317 = vmatpush2.bf16.msra.mxu1 %v2483_v0  ;;  %v2567_v63 = vld [vmem:[#allocation5 + $0x50] ss:$12 sps:$4 sm:$0xff]   ;;  %v2571_v0 = vld [vmem:[#allocation5 + $0xf8] ss:$12 sps:$4 sm:$0xff]  }
  0x70   :  { %1318 = vmatprep.subr.bf16.mxu1 %v2487_v1  ;;  %v2568_v1 = vld [vmem:[#allocation5 + $0x3f0] ss:$12 sps:$4 sm:$0xff]  }
  0x72   :  { %1278 = vmatpush2.bf16.msra.mxu0 %v2486_v2  ;;  %v2575_v2 = vld [vmem:[#allocation5 + $0x3dc] ss:$12 sps:$4 sm:$0xff]  }
  0x73   :  { %1329 = vmatprep.subr.bf16.mxu0 %v2494_v3  ;;  %1319 = vmatpush2.bf16.msra.mxu1 %v2491_v4  ;;  %v2572_v3 = vld [vmem:[#allocation5 + $0x38] ss:$12 sps:$4 sm:$0xff]   ;;  %v2576_v4 = vld [vmem:[#allocation5 + $0xe0] ss:$12 sps:$4 sm:$0xff]  }
  0x74   :  { %1370 = vmatprep.subr.bf16.mxu1 %v2499_v6  ;;  %v2573_v6 = vld [vmem:[#allocation5 + $0x3d8] ss:$12 sps:$4 sm:$0xff]  }
  0x75   :  { %1280 = vmatmul.mubr.bf16.vlgmr.msra.gmra.mxu0 %v2847_v5 }
  0x76   :  { %1330 = vmatpush1.bf16.msra.mxu0 %v2492_v7  ;;  %1321 = vmatmul.mubr.bf16.vlgmr.msra.gmra.mxu1 %v2849_v8  ;;  %v2580_v7 = vld [vmem:[#allocation5 + $0x3c4] ss:$12 sps:$4 sm:$0xff]  }
  0x77   :  { %1331 = vmatprep.subr.bf16.mxu0 %v2502_v9  ;;  %1371 = vmatpush1.bf16.msra.mxu1 %v2497_v10  ;;  %v2577_v9 = vld [vmem:[#allocation5 + $0x20] ss:$12 sps:$4 sm:$0xff]   ;;  %v2581_v10 = vld [vmem:[#allocation5 + $0xc8] ss:$12 sps:$4 sm:$0xff]  }
  0x78   :  { %1402 = vmatprep.mubr.bf16.mxu1 %v2785_v15  ;;  %1372 = vmatprep.subr.bf16.mxu1 %v2505_v11  ;;  %v2578_v11 = vld [vmem:[#allocation5 + $0x3c0] ss:$12 sps:$4 sm:$0xff]   ;;  %v2587_v15 = vld [vmem:[#allocation5 + $0x470] ss:$12 sps:$4 sm:$0xff]  }
  0x79   :  { %1361 = vmatprep.mubr.bf16.mxu0 %v2857_v41 }
  0x7a   :  { %1332 = vmatpush1.bf16.msra.mxu0 %v2500_v12  ;;  %v2585_v12 = vld [vmem:[#allocation5 + $0x2f0] ss:$12 sps:$4 sm:$0xff]  }
  0x7b   :  { %1333 = vmatprep.subr.bf16.mxu0 %v2508_v13  ;;  %1373 = vmatpush1.bf16.msra.mxu1 %v2503_v14  ;;  %v2584_v13 = vld [vmem:[#allocation5 + $0x8] ss:$12 sps:$4 sm:$0xff]   ;;  %v2866_v14 = vcombine.low %v2853_v39, %v2853_v39 }
  0x7c   :  { %1374 = vmatprep.subr.bf16.mxu1 %v2511_v16  ;;  %v2586_v16 = vld [vmem:[#allocation5 + $0x230] ss:$12 sps:$4 sm:$0xff]   ;;  %v2613_v39 = vld [vmem:[#allocation5 + $0x248] ss:$12 sps:$4 sm:$0xff]  }
  0x7e   :  { %1334 = vmatpush1.bf16.msra.mxu0 %v2506_v17  ;;  %v2589_v17 = vld [vmem:[#allocation5 + $0x2d8] ss:$12 sps:$4 sm:$0xff]  }
  0x7f   :  { %1335 = vmatprep.subr.bf16.mxu0 %v2514_v18  ;;  %1375 = vmatpush1.bf16.msra.mxu1 %v2509_v19  ;;  %v2588_v18 = vld [vmem:[#allocation5 + $0x3b0] ss:$12 sps:$4 sm:$0xff]   ;;  %v2591_v19 = vld [vmem:[#allocation5 + $0x458] ss:$12 sps:$4 sm:$0xff]  }
  0x80   :  { %1376 = vmatprep.subr.bf16.mxu1 %v2517_v20  ;;  %v2590_v20 = vld [vmem:[#allocation5 + $0x218] ss:$12 sps:$4 sm:$0xff]  }
  0x82   :  { %1336 = vmatpush1.bf16.msra.mxu0 %v2512_v21  ;;  %v2592_v21 = vld [vmem:[#allocation5 + $0x398] ss:$12 sps:$4 sm:$0xff]  }
  0x83   :  { %1337 = vmatprep.subr.bf16.mxu0 %v2520_v22  ;;  %1377 = vmatpush1.bf16.msra.mxu1 %v2515_v23  ;;  %v2593_v22 = vld [vmem:[#allocation5 + $0x2c0] ss:$12 sps:$4 sm:$0xff]  }
  0x84   :  { %1378 = vmatprep.subr.bf16.mxu1 %v2523_v24  ;;  %v2595_v23 = vld [vmem:[#allocation5 + $0x440] ss:$12 sps:$4 sm:$0xff]  }
  0x85   :  { %v2594_v24 = vld [vmem:[#allocation5 + $0x200] ss:$12 sps:$4 sm:$0xff]  }
  0x86   :  { %1338 = vmatpush1.bf16.msra.mxu0 %v2518_v25  ;;  %v2597_v25 = vld [vmem:[#allocation5 + $0x2a8] ss:$12 sps:$4 sm:$0xff]  }
  0x87   :  { %1339 = vmatprep.subr.bf16.mxu0 %v2526_v26  ;;  %1379 = vmatpush1.bf16.msra.mxu1 %v2521_v27  ;;  %v2596_v26 = vld [vmem:[#allocation5 + $0x380] ss:$12 sps:$4 sm:$0xff]   ;;  %v2599_v27 = vld [vmem:[#allocation5 + $0x428] ss:$12 sps:$4 sm:$0xff]  }
  0x88   :  { %1380 = vmatprep.subr.bf16.mxu1 %v2529_v28  ;;  %v2598_v28 = vld [vmem:[#allocation5 + $0x1e8] ss:$12 sps:$4 sm:$0xff]  }
  0x8a   :  { %1340 = vmatpush1.bf16.msra.mxu0 %v2524_v29  ;;  %v2603_v29 = vld [vmem:[#allocation5 + $0x410] ss:$12 sps:$4 sm:$0xff]  }
  0x8b   :  { %1341 = vmatprep.subr.bf16.mxu0 %v2532_v30  ;;  %1381 = vmatpush1.bf16.msra.mxu1 %v2527_v31  ;;  %v2602_v30 = vld [vmem:[#allocation5 + $0x1d0] ss:$12 sps:$4 sm:$0xff]   ;;  %v2605_v31 = vld [vmem:[#allocation5 + $0x278] ss:$12 sps:$4 sm:$0xff]  }
  0x8c   :  { %1382 = vmatprep.subr.bf16.mxu1 %v2535_v32  ;;  %v2604_v32 = vld [vmem:[#allocation5 + $0x350] ss:$12 sps:$4 sm:$0xff]  }
  0x8e   :  { %1342 = vmatpush1.bf16.msra.mxu0 %v2530_v33  ;;  %v2607_v33 = vld [vmem:[#allocation5 + $0x3f8] ss:$12 sps:$4 sm:$0xff]  }
  0x8f   :  { %1343 = vmatprep.subr.bf16.mxu0 %v2538_v34  ;;  %1383 = vmatpush1.bf16.msra.mxu1 %v2533_v35  ;;  %v2606_v34 = vld [vmem:[#allocation5 + $0x1b8] ss:$12 sps:$4 sm:$0xff]   ;;  %v2609_v35 = vld [vmem:[#allocation5 + $0x260] ss:$12 sps:$4 sm:$0xff]  }
  0x90   :  { %1384 = vmatprep.subr.bf16.mxu1 %v2541_v37  ;;  %v2611_v37 = vld [vmem:[#allocation5 + $0x3e0] ss:$12 sps:$4 sm:$0xff]  }
  0x92   :  { %1344 = vmatpush1.bf16.msra.mxu0 %v2536_v36  ;;  %v2608_v36 = vld [vmem:[#allocation5 + $0x338] ss:$12 sps:$4 sm:$0xff]  }
  0x93   :  { %1345 = vmatprep.subr.bf16.mxu0 %v2544_v40  ;;  %1385 = vmatpush1.bf16.msra.mxu1 %v2539_v38  ;;  %v2610_v38 = vld [vmem:[#allocation5 + $0x1a0] ss:$12 sps:$4 sm:$0xff]  }
  0x94   :  { %2207 = vmatprep.subr.bf16.mxu1 %v2545_v43  ;;  %v2612_v40 = vld [vmem:[#allocation5 + $0x320] ss:$12 sps:$4 sm:$0xff]   ;;  %v2616_v43 = vld [vmem:[#allocation5 + $0x308] ss:$12 sps:$4 sm:$0xff]  }
  0x96   :  { %1346 = vmatpush2.bf16.msra.mxu0 %v2542_v42  ;;  %1403 = vmatmul.mubr.bf16.vlgmr.msra.gmra.mxu1 %v2860_v44  ;;  %v2614_v42 = vld [vmem:[#allocation5 + $0x188] ss:$12 sps:$4 sm:$0xff]  }
  0x97   :  { %1347 = vmatprep.subr.bf16.mxu0 %v2550_v45  ;;  %2208 = vmatpush3.bf16.msra.mxu1 %v2547_v46  ;;  %v2617_v45 = vld [vmem:[#allocation5 + $0x530] ss:$12 sps:$4 sm:$0xff]   ;;  %v2786_v46 = vmov 0.0  }
  0x98   :  { %1443 = vmatprep.mubr.bf16.mxu1 %v2841_v48  ;;  %2209 = vmatprep.subr.bf16.mxu1 %v2551_v47  ;;  %v2563_v48 = vld [vmem:[#allocation5 + $0x408] ss:$12 sps:$4 sm:$0xff]   ;;  %v2618_v47 = vld [vmem:[#allocation5 + $0x518] ss:$12 sps:$4 sm:$0xff]  }
  0x9a   :  { %1348 = vmatpush2.bf16.msra.mxu0 %v2548_v49  ;;  %v2619_v49 = vld [vmem:[#allocation5 + $0x500] ss:$12 sps:$4 sm:$0xff]  }
  0x9b   :  { %1349 = vmatprep.subr.bf16.mxu0 %v2555_v50  ;;  %2210 = vmatpush3.bf16.msra.mxu1 %v2552_v51  ;;  %v2620_v50 = vld [vmem:[#allocation5 + $0x4e8] ss:$12 sps:$4 sm:$0xff]   ;;  %v2622_v51 = vld [vmem:[#allocation5 + $0x4b8] ss:$12 sps:$4 sm:$0xff]  }
  0x9c   :  { %2211 = vmatprep.subr.bf16.mxu1 %v2556_v53  ;;  %v2623_v53 = vld [vmem:[#allocation5 + $0x4a0] ss:$12 sps:$4 sm:$0xff]  }
  0x9e   :  { %1350 = vmatpush2.bf16.msra.mxu0 %v2553_v54  ;;  %v2624_v54 = vld [vmem:[#allocation5 + $0x488] ss:$12 sps:$4 sm:$0xff]  }
  0x9f   :  { %1351 = vmatprep.subr.bf16.mxu0 %v2560_v55  ;;  %2212 = vmatpush3.bf16.msra.mxu1 %v2557_v56  ;;  %v2625_v55 = vld [vmem:[#allocation7 + $0x78] sm:$0xff]  }
  0xa0   :  { %2213 = vmatprep.subr.bf16.mxu1 %v2561_v57  ;;  %v2626_v56 = vld [vmem:[#allocation7 + $0x38] sm:$0xff]   ;;  %v2627_v57 = vld [vmem:[#allocation7 + $0x70] sm:$0xff]  }
  0xa2   :  { %1352 = vmatpush2.bf16.msra.mxu0 %v2558_v58  ;;  %v2628_v58 = vld [vmem:[#allocation7 + $0x30] sm:$0xff]  }
  0xa3   :  { %1353 = vmatprep.subr.bf16.mxu0 %v2565_v59  ;;  %2214 = vmatpush3.bf16.msra.mxu1 %v2562_v60  ;;  %v2629_v59 = vld [vmem:[#allocation7 + $0x68] sm:$0xff]  }
  0xa4   :  { %2215 = vmatprep.subr.bf16.mxu1 %v2566_v61  ;;  %v2630_v60 = vld [vmem:[#allocation7 + $0x28] sm:$0xff]   ;;  %v2631_v61 = vld [vmem:[#allocation7 + $0x60] sm:$0xff]  }
  0xa6   :  { %1354 = vmatpush2.bf16.msra.mxu0 %v2563_v48  ;;  %v2632_v48 = vld [vmem:[#allocation7 + $0x20] sm:$0xff]  }
  0xa7   :  { %1355 = vmatprep.subr.bf16.mxu0 %v2570_v62  ;;  %2216 = vmatpush3.bf16.msra.mxu1 %v2567_v63  ;;  %v2634_v62 = vld [vmem:[#allocation7 + $0x18] sm:$0xff]   ;;  %v2635_v63 = vld [vmem:[#allocation7 + $0x50] sm:$0xff]  }
  0xa8   :  { %2217 = vmatprep.subr.bf16.mxu1 %v2571_v0  ;;  %v2636_v0 = vld [vmem:[#allocation7 + $0x10] sm:$0xff]  }
  0xaa   :  { %1356 = vmatpush2.bf16.msra.mxu0 %v2568_v1  ;;  %v2637_v1 = vld [vmem:[#allocation7 + $0x48] sm:$0xff]  }
  0xab   :  { %1357 = vmatprep.subr.bf16.mxu0 %v2575_v2  ;;  %2218 = vmatpush3.bf16.msra.mxu1 %v2572_v3  ;;  %v2638_v2 = vld [vmem:[#allocation7 + $0x8] sm:$0xff]   ;;  %v2639_v3 = vld [vmem:[#allocation7 + $0x40] sm:$0xff]  }
  0xac   :  { %2219 = vmatprep.subr.bf16.mxu1 %v2576_v4  ;;  %v2640_v4 = vld [vmem:[#allocation7] sm:$0xff]  }
  0xae   :  { %1358 = vmatpush2.bf16.msra.mxu0 %v2573_v6 }
  0xaf   :  { %1359 = vmatprep.subr.bf16.mxu0 %v2580_v7  ;;  %2220 = vmatpush3.bf16.msra.mxu1 %v2577_v9 }
  0xb0   :  { %2221 = vmatprep.subr.bf16.mxu1 %v2581_v10 }
  0xb2   :  { %1360 = vmatpush2.bf16.msra.mxu0 %v2578_v11 }
  0xb3   :  { %2229 = vmatprep.subr.bf16.mxu0 %v2585_v12  ;;  %2222 = vmatpush3.bf16.msra.mxu1 %v2584_v13 }
  0xb4   :  { %2251 = vmatprep.subr.bf16.mxu1 %v2587_v15 }
  0xb5   :  { %1362 = vmatmul.mubr.bf16.vlgmr.msra.gmra.mxu0 %v2866_v14 }
  0xb6   :  { %2230 = vmatpush3.bf16.msra.mxu0 %v2586_v16  ;;  %1483 = vmatprep.mubr.bf16.mxu0 %v2844_v52  ;;  %v2601_v52 = vld [vmem:[#allocation5 + $0x290] ss:$12 sps:$4 sm:$0xff]  }
  0xb7   :  { %1444 = vmatmul.mubr.bf16.vlgmr.msra.gmra.mxu1 %v2847_v5  ;;  %2231 = vmatprep.subr.bf16.mxu0 %v2589_v17  ;;  %v2600_v5 = vld [vmem:[#allocation5 + $0x368] ss:$12 sps:$4 sm:$0xff]  }
  0xb8   :  { %2252 = vmatpush3.bf16.msra.mxu1 %v2588_v18  ;;  %1523 = vmatprep.mubr.bf16.mxu1 %v2857_v41  ;;  %v2615_v41 = vld [vmem:[#allocation5 + $0x3c8] ss:$12 sps:$4 sm:$0xff]   ;;  %v2644_v18 = vld [vmem:[#allocation7 + $0xa0] sm:$0xff]  }
  0xb9   :  { %2253 = vmatprep.subr.bf16.mxu1 %v2591_v19  ;;  %v2642_v16 = vld [vmem:[#allocation7 + $0xb0] sm:$0xff]   ;;  %v2643_v17 = vld [vmem:[#allocation7 + $0xa8] sm:$0xff]   ;;  %v2645_v19 = vld [vmem:[#allocation7 + $0x98] sm:$0xff]  }
  0xba   :  { %2232 = vmatpush3.bf16.msra.mxu0 %v2590_v20  ;;  %v2646_v20 = vld [vmem:[#allocation7 + $0x90] sm:$0xff]  }
  0xbb   :  { %2233 = vmatprep.subr.bf16.mxu0 %v2593_v22  ;;  %v2648_v22 = vld [vmem:[#allocation7 + $0x80] sm:$0xff]  }
  0xbc   :  { %2254 = vmatpush3.bf16.msra.mxu1 %v2592_v21  ;;  %v2647_v21 = vld [vmem:[#allocation7 + $0x88] sm:$0xff]  }
  0xbd   :  { %2255 = vmatprep.subr.bf16.mxu1 %v2595_v23 }
  0xbe   :  { %2234 = vmatpush3.bf16.msra.mxu0 %v2594_v24 }
  0xbf   :  { %2235 = vmatprep.subr.bf16.mxu0 %v2597_v25 }
  0xc0   :  { %2256 = vmatpush3.bf16.msra.mxu1 %v2596_v26 }
  0xc1   :  { %2257 = vmatprep.subr.bf16.mxu1 %v2599_v27  ;;  %v311_v27 = vlaneseq }
  0xc2   :  { %2236 = vmatpush3.bf16.msra.mxu0 %v2598_v28 }
  0xc3   :  { %2237 = vmatprep.subr.bf16.mxu0 %v2601_v52  ;;  %v312_v28 = vshrl.u32 %v311_v27, 7  ;;  %v2650_v27 = vld [vmem:[#allocation8 + $0x30] sm:$0xff]  }
  0xc4   :  { %2258 = vmatpush3.bf16.msra.mxu1 %v2600_v5  ;;  %v309_v5 = vld [vmem:[%s2919_s2] sm:$0x7] }
  0xc5   :  { %2259 = vmatprep.subr.bf16.mxu1 %v2603_v29  ;;  %v313_v52 = vsub.s32 0, %v312_v28  ;;  %v317_v29 = vsub.s32 1, %v312_v28 }
  0xc6   :  { %2238 = vmatpush3.bf16.msra.mxu0 %v2602_v30 }
  0xc7   :  { %2239 = vmatprep.subr.bf16.mxu0 %v2605_v31  ;;  %v314_v30 = vrot.slane %v309_v5, %v313_v52  ;;  %v318_v31 = vrot.slane %v309_v5, %v317_v29  ;;  %v2652_v52 = vld [vmem:[#allocation8 + $0x20] sm:$0xff]   ;;  %v2654_v29 = vld [vmem:[#allocation8 + $0x10] sm:$0xff]  }
  0xc8   :  { %2260 = vmatpush3.bf16.msra.mxu1 %v2604_v32 }
  0xc9   :  { %2261 = vmatprep.subr.bf16.mxu1 %v2607_v33 }
  0xca   :  { %2240 = vmatpush3.bf16.msra.mxu0 %v2606_v34 }
  0xcb   :  { %2241 = vmatprep.subr.bf16.mxu0 %v2609_v35 }
  0xcc   :  { %2262 = vmatpush3.bf16.msra.mxu1 %v2608_v36 }
  0xcd   :  { %2263 = vmatprep.subr.bf16.mxu1 %v2611_v37 }
  0xce   :  { %2242 = vmatpush3.bf16.msra.mxu0 %v2610_v38 }
  0xcf   :  { %2243 = vmatprep.subr.bf16.mxu0 %v2613_v39 }
  0xd0   :  { %2264 = vmatpush3.bf16.msra.mxu1 %v2612_v40 }
  0xd1   :  { %2265 = vmatprep.subr.bf16.mxu1 %v2615_v41 }
  0xd2   :  { %2244 = vmatpush3.bf16.msra.mxu0 %v2614_v42 }
  0xd3   :  { %2322 = vmatprep.subr.bf16.mxu0 %v2786_v46 }
  0xd4   :  { %2266 = vmatpush3.bf16.msra.mxu1 %v2616_v43 }
  0xd5   :  { %1484 = vmatmul.mubr.bf16.vlgmr.msra.gmra.mxu0 %v2849_v8  ;;  %v2621_v8 = vld [vmem:[#allocation5 + $0x4d0] ss:$12 sps:$4 sm:$0xff]   ;;  %2282 = vmatprep.subr.bf16.mxu1 %v2625_v55 }
  0xd6   :  { %2323 = vmatpush3.bf16.msra.mxu0 %v2617_v45  ;;  %2338 = vmatprep.mubr.msk.bf16.mxu0 %vm2787_vm0, %v2786_v46 }
  0xd7   :  { %1524 = vmatmul.mubr.bf16.vlgmr.msra.gmra.mxu1 %v2866_v14  ;;  %2324 = vmatprep.subr.bf16.mxu0 %v2786_v46  ;;  %v2641_v14 = vld [vmem:[#allocation7 + $0xb8] sm:$0xff]  }
  0xd8   :  { %2283 = vmatpush3.bf16.msra.mxu1 %v2626_v56 }
  0xd9   :  { %2284 = vmatprep.subr.bf16.mxu1 %v2627_v57 }
  0xda   :  { %2325 = vmatpush3.bf16.msra.mxu0 %v2618_v47 }
  0xdb   :  { %2326 = vmatprep.subr.bf16.mxu0 %v2786_v46 }
  0xdc   :  { %2285 = vmatpush3.bf16.msra.mxu1 %v2628_v58 }
  0xdd   :  { %2286 = vmatprep.subr.bf16.mxu1 %v2629_v59 }
  0xde   :  { %2327 = vmatpush3.bf16.msra.mxu0 %v2619_v49 }
  0xdf   :  { %2328 = vmatprep.subr.bf16.mxu0 %v2786_v46 }
  0xe0   :  { %2287 = vmatpush3.bf16.msra.mxu1 %v2630_v60 }
  0xe1   :  { %2288 = vmatprep.subr.bf16.mxu1 %v2631_v61 }
  0xe2   :  { %2329 = vmatpush3.bf16.msra.mxu0 %v2620_v50 }
  0xe3   :  { %2330 = vmatprep.subr.bf16.mxu0 %v2786_v46 }
  0xe4   :  { %2289 = vmatpush3.bf16.msra.mxu1 %v2632_v48 }
  0xe6   :  { %2331 = vmatpush3.bf16.msra.mxu0 %v2621_v8 }
  0xe7   :  { %2332 = vmatprep.subr.bf16.mxu0 %v2786_v46 }
  0xea   :  { %2333 = vmatpush3.bf16.msra.mxu0 %v2622_v51 }
  0xeb   :  { %2334 = vmatprep.subr.bf16.mxu0 %v2786_v46 }
  0xee   :  { %2335 = vmatpush3.bf16.msra.mxu0 %v2623_v53 }
  0xef   :  { %2336 = vmatprep.subr.bf16.mxu0 %v2786_v46 }
  0xf2   :  { %2337 = vmatpush3.bf16.msra.mxu0 %v2624_v54 }
  0xf3   :  { %2342 = vmatprep.subr.bf16.mxu0 %v2786_v46 }
  0xf5   :  { %2339 = vmatmul.mubr.bf16.vlgmr.msra.gmra.mxu0 %v2860_v44  ;;  %v2633_v44 = vld [vmem:[#allocation7 + $0x58] sm:$0xff]  }
  0xf6   :  { %2358 = vmatprep.mubr.msk.bf16.mxu0 %vm2787_vm0, %v2786_v46  ;;  %2290 = vmatprep.subr.bf16.mxu1 %v2633_v44 }
  0xf7   :  { %2291 = vmatpush3.bf16.msra.mxu1 %v2634_v62  ;;  %2343 = vmatpush3.bf16.msra.mxu0 %v2641_v14 }
  0xf8   :  { %2292 = vmatprep.subr.bf16.mxu1 %v2635_v63  ;;  %2344 = vmatprep.subr.bf16.mxu0 %v2786_v46 }
  0xfb   :  { %2293 = vmatpush3.bf16.msra.mxu1 %v2636_v0  ;;  %2345 = vmatpush3.bf16.msra.mxu0 %v2642_v16 }
  0xfc   :  { %2294 = vmatprep.subr.bf16.mxu1 %v2637_v1  ;;  %2346 = vmatprep.subr.bf16.mxu0 %v2786_v46 }
  0xff   :  { %2295 = vmatpush3.bf16.msra.mxu1 %v2638_v2  ;;  %2347 = vmatpush3.bf16.msra.mxu0 %v2643_v17 }
 0x100   :  { %2296 = vmatprep.subr.bf16.mxu1 %v2639_v3  ;;  %2348 = vmatprep.subr.bf16.mxu0 %v2786_v46 }
 0x103   :  { %2297 = vmatpush3.bf16.msra.mxu1 %v2640_v4  ;;  %2349 = vmatpush3.bf16.msra.mxu0 %v2644_v18 }
 0x104   :  { %2362 = vmatprep.subr.bf16.mxu1 %v2786_v46  ;;  %2350 = vmatprep.subr.bf16.mxu0 %v2786_v46 }
 0x107   :  { %2351 = vmatpush3.bf16.msra.mxu0 %v2645_v19 }
 0x108   :  { %2352 = vmatprep.subr.bf16.mxu0 %v2786_v46 }
 0x10b   :  { %2353 = vmatpush3.bf16.msra.mxu0 %v2646_v20 }
 0x10c   :  { %2354 = vmatprep.subr.bf16.mxu0 %v2786_v46 }
 0x10f   :  { %2355 = vmatpush3.bf16.msra.mxu0 %v2647_v21 }
 0x110   :  { %2356 = vmatprep.subr.bf16.mxu0 %v2786_v46 }
 0x113   :  { %2357 = vmatpush3.bf16.msra.mxu0 %v2648_v22 }
 0x135   :  { %v1281_v6 = vpop.f32.mrf.mxu0 }
 0x136   :  { %v1322_v9 = vpop.f32.mrf.mxu1  ;;  %v1282_v32 = vadd.f32 %v1281_v6, %v314_v30  ;;  %v321_v6 = vsub.s32 2, %v312_v28  ;;  %v2651_v28 = vld [vmem:[#allocation8 + $0x28] sm:$0xff]  }
 0x137   :  { %v1283_v7 = vpop.f32.mrf.mxu0  ;;  %v2655_v30 = vld [vmem:[#allocation8 + $0x8] sm:$0xff]  }
 0x138   :  { %v1324_v11 = vpop.f32.mrf.mxu1  ;;  %v1284_v33 = vadd.f32 %v1283_v7, %v318_v31  ;;  %v1323_v34 = vadd.f32 %v1322_v9, %v1282_v32  ;;  %v322_v7 = vrot.slane %v309_v5, %v321_v6  ;;  %v2653_v5 = vld [vmem:[#allocation8 + $0x18] sm:$0xff]   ;;  %v2656_v31 = vld [vmem:[#allocation8] sm:$0xff]  }
 0x139   :  { %v1285_v10 = vpop.f32.mrf.mxu0 }
 0x13a   :  { %v1326_v13 = vpop.f32.mrf.mxu1  ;;  %v1325_v36 = vadd.f32 %v1324_v11, %v1284_v33 }
 0x13b   :  { %v1286_v12 = vpop.f32.mrf.mxu0 }
 0x13c   :  { %v1327_v15 = vpop.f32.mrf.mxu1 }
 0x156   :  { %v1404_v23 = vpop.f32.mrf.mxu1 }
 0x158   :  { %v1406_v24 = vpop.f32.mrf.mxu1 }
 0x15a   :  { %v1408_v25 = vpop.f32.mrf.mxu1 }
 0x15c   :  { %v1409_v26 = vpop.f32.mrf.mxu1 }
 0x15d   :  { %v2649_v26 = vld [vmem:[#allocation8 + $0x38] sm:$0xff]  }
 0x175   :  { %v1363_v35 = vpop.f32.mrf.mxu0 }
 0x176   :  { %v1364_v37 = vadd.f32 %v1363_v35, %v1323_v34 }
 0x177   :  { %v1365_v38 = vpop.f32.mrf.mxu0  ;;  %v2223_v39 = vpop.f32.mrf.mxu1 }
 0x178   :  { %v1405_v40 = vadd.f32 %v1404_v23, %v1364_v37  ;;  %v1366_v41 = vadd.f32 %v1365_v38, %v1325_v36  ;;  %v2173_v37 = vld [vmem:[%s2921_s4] ss:$0 sm:$0xff]  ;;  %s2749_s4 = scalar_lea.vmem %s1988_s27, 128 }
 0x179   :  { %v1367_v42 = vpop.f32.mrf.mxu0  ;;  %v2224_v43 = vpop.f32.mrf.mxu1  ;;  %p2750_p6 = scmp.ne.s32.totalorder %s1988_s27, %s2749_s4  ;;  %p2755_p8 = scmp.lt.s32.totalorder %s2749_s4, %s2749_s4 }
 0x17a   :  { %v1571_v45 = vsub.f32 0.0, %v1405_v40  ;;  %v1407_v47 = vadd.f32 %v1406_v24, %v1366_v41  ;;  %v2225_v9 = vadd.f32 %v2224_v43, %v2223_v39 }
 0x17b   :  { %v1368_v49 = vpop.f32.mrf.mxu0  ;;  %v2226_v50 = vpop.f32.mrf.mxu1  ;;  %p2756_p9 = por %p2755_p8, %p2754_p7 }
 0x17c   :  { %v1574_v8 = vmul.f32 1.442695, %v1571_v45  ;;  %v1572_v51 = vsub.f32 0.0, %v1407_v47  ;;  %v1446_v11 = vadd.f32 %v2225_v9, %v322_v7 }
 0x17d   :  { %v2227_v53 = vpop.f32.mrf.mxu1  ;;  %p2757_p10 = pnand %p2756_p9, %p2750_p6 }
 0x17e   :  { %2657 = vpow2.f32 %v1574_v8  ;;  %v1576_v54 = vmul.f32 1.442695, %v1572_v51 }
 0x180   :  { %2659 = vpow2.f32 %v1576_v54 }
 0x18b   :  { %v2658_v55 = vpop.eup %2657 }
 0x18c   :  { %v1580_v56 = vadd.f32 1.0, %v2658_v55 }
 0x18d   :  { %v2660_v57 = vpop.eup %2659 }
 0x18e   :  { %v1581_v58 = vadd.f32 1.0, %v2660_v57  ;;  %2661 = vrcp.f32 %v1580_v56 }
 0x190   :  { %2663 = vrcp.f32 %v1581_v58 }
 0x195   :  { %v2245_v59 = vpop.f32.mrf.mxu0 }
 0x197   :  { %v2246_v60 = vpop.f32.mrf.mxu0  ;;  %v2267_v61 = vpop.f32.mrf.mxu1 }
 0x198   :  { %v2247_v10 = vadd.f32 %v2246_v60, %v2245_v59 }
 0x199   :  { %v2248_v48 = vpop.f32.mrf.mxu0  ;;  %v2268_v44 = vpop.f32.mrf.mxu1 }
 0x19a   :  { %v1486_v12 = vadd.f32 %v2247_v10, %v1446_v11  ;;  %v2269_v13 = vadd.f32 %v2268_v44, %v2267_v61 }
 0x19b   :  { %v2249_v62 = vpop.f32.mrf.mxu0  ;;  %v2270_v63 = vpop.f32.mrf.mxu1 }
 0x19c   :  { %v2662_v0 = vpop.eup %2661  ;;  %v1526_v14 = vadd.f32 %v2269_v13, %v1486_v12 }
 0x19d   :  { %v2664_v1 = vpop.eup %2663  ;;  %v2271_v2 = vpop.f32.mrf.mxu1  ;;  %v1586_v4 = vpack.c.bf16 %v2662_v0, %v2662_v0 }
 0x19e   :  { %v1587_v3 = vpack.c.bf16 %v2664_v1, %v2664_v1 }
 0x1a0   :  { %1820 = vmatprep.mubr.bf16.mxu1 %v1587_v3 }
 0x1a1   :  { %1821 = vmatmul.mubr.bf16.vlgmr.msra.gmra.mxu1 %v1586_v4 }
 0x1a2   :  { %2378 = vmatprep.mubr.msk.bf16.mxu1 %vm2787_vm0, %v2786_v46  ;;  %2363 = vmatpush3.bf16.msra.mxu1 %v2649_v26 }
 0x1a3   :  { %2364 = vmatprep.subr.bf16.mxu1 %v2786_v46 }
 0x1a6   :  { %2365 = vmatpush3.bf16.msra.mxu1 %v2650_v27 }
 0x1a7   :  { %2366 = vmatprep.subr.bf16.mxu1 %v2786_v46 }
 0x1aa   :  { %2367 = vmatpush3.bf16.msra.mxu1 %v2651_v28 }
 0x1ab   :  { %2368 = vmatprep.subr.bf16.mxu1 %v2786_v46 }
 0x1ae   :  { %2369 = vmatpush3.bf16.msra.mxu1 %v2652_v52 }
 0x1af   :  { %2370 = vmatprep.subr.bf16.mxu1 %v2786_v46 }
 0x1b2   :  { %2371 = vmatpush3.bf16.msra.mxu1 %v2653_v5 }
 0x1b3   :  { %2372 = vmatprep.subr.bf16.mxu1 %v2786_v46 }
 0x1b5   :  { %v1565_v15 = vpop.f32.mrf.mxu0 }
 0x1b6   :  { %v1566_v16 = vadd.f32 %v1565_v15, %v1526_v14  ;;  %2373 = vmatpush3.bf16.msra.mxu1 %v2654_v29 }
 0x1b7   :  { %v2340_v17 = vpop.f32.mrf.mxu0  ;;  %2374 = vmatprep.subr.bf16.mxu1 %v2786_v46 }
 0x1b8   :  { %v1573_v18 = vsub.f32 0.0, %v1566_v16 }
 0x1b9   :  { %v1568_v19 = vpop.f32.mrf.mxu0 }
 0x1ba   :  { %v1578_v20 = vmul.f32 1.442695, %v1573_v18  ;;  %2375 = vmatpush3.bf16.msra.mxu1 %v2655_v30 }
 0x1bb   :  { %v2341_v21 = vpop.f32.mrf.mxu0  ;;  %2376 = vmatprep.subr.bf16.mxu1 %v2786_v46  ;;  %v2198_v46 = vld [vmem:[%s2923_s6] ss:$0 sm:$0xff] }
 0x1bc   :  { %2665 = vpow2.f32 %v1578_v20 }
 0x1be   :  { %2377 = vmatpush3.bf16.msra.mxu1 %v2656_v31 }
 0x1c9   :  { %v2666_v22 = vpop.eup %2665 }
 0x1ca   :  { %v1582_v23 = vadd.f32 1.0, %v2666_v22 }
 0x1cc   :  { %2667 = vrcp.f32 %v1582_v23 }
 0x1d9   :  { %v2668_v24 = vpop.eup %2667 }
 0x1da   :  { %v1588_v25 = vpack.c.bf16 %v2668_v24, %v2668_v24 }
 0x1dc   :  { %2359 = vmatmul.mubr.bf16.vlgmr.msra.gmra.mxu0 %v1588_v25 }
 0x261   :  { %v2298_v32 = vpop.f32.mrf.mxu1 }
 0x263   :  { %v2299_v33 = vpop.f32.mrf.mxu1 }
 0x264   :  { %v2300_v36 = vadd.f32 %v2299_v33, %v2298_v32 }
 0x265   :  { %v2301_v34 = vpop.f32.mrf.mxu1 }
 0x266   :  { %v1823_v38 = vadd.f32 %v2300_v36, %v2173_v37 }
 0x267   :  { %v2302_v35 = vpop.f32.mrf.mxu1 }
 0x29c   :  { %v1862_v39 = vpop.f32.mrf.mxu0 }
 0x29d   :  { %v1863_v40 = vadd.f32 %v1862_v39, %v1823_v38 }
 0x29e   :  { %v2360_v41 = vpop.f32.mrf.mxu0 }
 0x29f   :  { %v1868_v42 = vpack.c.bf16 %v1863_v40, %v1863_v40 }
 0x2a0   :  { %v1865_v43 = vpop.f32.mrf.mxu0 }
 0x2a1   :  { %2379 = vmatmul.mubr.bf16.vlgmr.msra.gmra.mxu1 %v1868_v42 }
 0x2a2   :  { %v2361_v45 = vpop.f32.mrf.mxu0 }
 0x361   :  { %v1974_v47 = vpop.f32.mrf.mxu1 }
 0x362   :  { %v1975_v49 = vadd.f32 %v2198_v46, %v1974_v47 }
 0x363   :  { %v2380_v50 = vpop.f32.mrf.mxu1 }
 0x364   :  { %1980 = vst [vmem:[#allocation10] sm:$0xff] %v1975_v49 }
 0x365   :  { %v1977_v8 = vpop.f32.mrf.mxu1 }
 0x366   :  { %2760 = shalt.err (!%p2757_p10)
}
 0x367   :  { %1990 = dma.vmem_to_hbm [thread:$0]  %s1988_s27, 128, %s2924_s7, [#allocation4]   ;;  %v2381_v51 = vpop.f32.mrf.mxu1 }
 0x368   :  { %2775 = dma.done.wait [#allocation4], 128  }
 0x369   :  { %2776 = vsyncadd [#allocation4], 4294967168 }
 0x36a   :  { %1994 = vsyncpa [#allocation3], 1 }
 0x36b   :  { %1995 = vsyncpa [#allocation6], 1 }
 0x36c   :  { %1996 = vsyncpa [#allocation9], 1 }
 0x36d   :  { %1997 = vsyncpa [#allocation4], 1 }

</bundles_post_ra>
